<compile_context>
chip_gen: v5e
topology: v5e:2x2
jax: 0.10.0
libtpu: 0.0.40
codegen_flags: <defaults>
</compile_context>

<pallas_src>
import math
import functools

import jax
import jax.numpy as jnp
from jax.experimental import pallas as pl
from jax.experimental.pallas import tpu as pltpu


def siren_kernel(x_ref, wt_ref, b_ref, o_ref, *, w0):
    # x_ref:  (TM, dim_in)      -- one row-tile of the flattened input
    # wt_ref: (dim_in, dim_out) -- pre-transposed weight, VMEM-resident
    # b_ref:  (1, dim_out)      -- bias, VMEM-resident
    # o_ref:  (TM, dim_out)
    out = jnp.dot(x_ref[...], wt_ref[...], preferred_element_type=jnp.float32)
    out = out + b_ref[...]
    o_ref[...] = jnp.sin(w0 * out).astype(o_ref.dtype)


def _round_up(x, n):
    return -(-x // n) * n


def _choose_tile_m(m_padded, dim_in, dim_out, vmem_budget_bytes=12 * 1024 * 1024):
    """Largest TM (multiple of 8, <= 1024) whose double-buffered x/out tiles
    plus the resident (worst-case double-buffered) weight/bias fit the budget.
    Budget is conservative enough for v5e's 16 MiB default scoped VMEM and
    v7x's 64 MiB physical VMEM without touching vmem_limit_bytes."""
    bytes_per_elem = 4  # f32
    resident = 2 * (dim_in * dim_out + dim_out) * bytes_per_elem
    per_row = 2 * (dim_in + dim_out) * bytes_per_elem  # double-buffered x + out
    avail = max(vmem_budget_bytes - resident, per_row * 8)
    tm = min(1024, avail // per_row, m_padded)
    tm = max(8, (tm // 8) * 8)
    return int(tm)


def siren_forward(x, weight, bias, w0=1.0, tile_m=None):
    """x: (..., dim_in) float32; weight: (dim_out, dim_in); bias: (dim_out,)."""
    dim_out, dim_in = weight.shape
    lead_shape = x.shape[:-1]
    m = int(functools.reduce(lambda a, b: a * b, lead_shape, 1))

    x2d = x.reshape(m, dim_in)
    wt = weight.T  # one-time wrapper transpose -> (dim_in, dim_out)
    b2d = bias.reshape(1, dim_out)

    # Pad M so every tile is full (no masking needed in the kernel).
    m8 = max(8, _round_up(m, 8))
    tm = tile_m if tile_m is not None else _choose_tile_m(m8, dim_in, dim_out)
    tm = max(8, (min(tm, m8) // 8) * 8)
    m_pad = _round_up(m8, tm)
    if m_pad != m:
        x2d = jnp.pad(x2d, ((0, m_pad - m), (0, 0)))

    grid = (m_pad // tm,)

    cost = pl.CostEstimate(
        flops=2 * m_pad * dim_in * dim_out,
        transcendentals=m_pad * dim_out,
        bytes_accessed=4 * (m_pad * dim_in + dim_in * dim_out + dim_out
                            + m_pad * dim_out),
    )

    out2d = pl.pallas_call(
        functools.partial(siren_kernel, w0=float(w0)),
        out_shape=jax.ShapeDtypeStruct((m_pad, dim_out), x.dtype),
        grid_spec=pltpu.PrefetchScalarGridSpec(
            num_scalar_prefetch=0,
            grid=grid,
            in_specs=[
                # x: tiled over rows
                pl.BlockSpec((tm, dim_in), lambda i: (i, 0)),
                # W^T: constant block index -> stays VMEM-resident across steps
                pl.BlockSpec((dim_in, dim_out), lambda i: (0, 0)),
                # bias: constant block index -> resident
                pl.BlockSpec((1, dim_out), lambda i: (0, 0)),
            ],
            out_specs=pl.BlockSpec((tm, dim_out), lambda i: (i, 0)),
        ),
        compiler_params=pltpu.CompilerParams(
            dimension_semantics=("parallel",),
        ),
        cost_estimate=cost,
    )(x2d, wt, b2d)

    if m_pad != m:
        out2d = out2d[:m]
    return out2d.reshape(*lead_shape, dim_out)


def init_siren_params(key, dim_in, dim_out, w0=1.0, c=6.0, is_first=False):
    """Deterministic SIREN init: uniform(-w_std, w_std)."""
    w_std = (1.0 / dim_in) if is_first else (math.sqrt(c / dim_in) / w0)
    kw, kb = jax.random.split(key)
    weight = jax.random.uniform(
        kw, (dim_out, dim_in), dtype=jnp.float32, minval=-w_std, maxval=w_std
    )
    bias = jax.random.uniform(
        kb, (dim_out,), dtype=jnp.float32, minval=-w_std, maxval=w_std
    )
    return weight, bias


if __name__ == "__main__":
    # Small shapes consistent with the module: batch=2, seq=8, dim_in=32, dim_out=32
    batch, seq, dim_in, dim_out = 2, 8, 32, 32
    w0, c = 1.0, 6.0

    key = jax.random.PRNGKey(0)
    kx, kp = jax.random.split(key)

    x = jax.random.normal(kx, (batch, seq, dim_in), dtype=jnp.float32)
    weight, bias = init_siren_params(kp, dim_in, dim_out, w0=w0, c=c, is_first=False)

    out = siren_forward(x, weight, bias, w0=w0)
    out = jax.block_until_ready(out)

    # Reference check in plain JAX (same semantics as F.linear + Sine)
    ref = jnp.sin(w0 * (x @ weight.T + bias))
    assert out.shape == (batch, seq, dim_out)
    assert jnp.allclose(out, ref, atol=1e-5, rtol=1e-5)

    # Also exercise the multi-tile / padded-M path with a larger M that is
    # not a multiple of the tile size.
    big_m, tm_test = 1000, 256
    xb = jax.random.normal(jax.random.PRNGKey(1), (big_m, dim_in), dtype=jnp.float32)
    outb = jax.block_until_ready(siren_forward(xb, weight, bias, w0=w0, tile_m=tm_test))
    refb = jnp.sin(w0 * (xb @ weight.T + bias))
    assert outb.shape == (big_m, dim_out)
    assert jnp.allclose(outb, refb, atol=1e-5, rtol=1e-5)

    print("KERNEL_OK")
</pallas_src>

<mosaic_0001>
module attributes {stable_mosaic.version = 11 : i64} {
  func.func @siren_kernel(%arg0: i32, %arg1: memref<16x32xf32, #tpu.memory_space<vmem>>, %arg2: memref<32x32xf32, #tpu.memory_space<vmem>>, %arg3: memref<1x32xf32, #tpu.memory_space<vmem>>, %arg4: memref<16x32xf32, #tpu.memory_space<vmem>>) attributes {dimension_semantics = [#tpu.dimension_semantics<parallel>], iteration_bounds = array<i64: 1>, scalar_prefetch = 0 : i64, scratch_operands = 0 : i64, tpu.core_type = #tpu.core_type<tc>, window_params = [{transform_indices = @transform_0, window_bounds = array<i64: 16, 32>}, {pipeline_mode = #tpu.pipeline_mode<synchronous>, transform_indices = @transform_1, window_bounds = array<i64: 32, 32>}, {pipeline_mode = #tpu.pipeline_mode<synchronous>, transform_indices = @transform_2, window_bounds = array<i64: 1, 32>}, {transform_indices = @transform_3, window_bounds = array<i64: 16, 32>}]} {
    %c0 = arith.constant 0 : index
    %c0_0 = arith.constant 0 : index
    %0 = vector.load %arg1[%c0, %c0_0] : memref<16x32xf32, #tpu.memory_space<vmem>>, vector<16x32xf32>
    %c0_1 = arith.constant 0 : index
    %c0_2 = arith.constant 0 : index
    %1 = vector.load %arg2[%c0_1, %c0_2] : memref<32x32xf32, #tpu.memory_space<vmem>>, vector<32x32xf32>
    %cst = arith.constant dense<0.000000e+00> : vector<16x32xf32>
    %2 = tpu.matmul %0, %1, %cst {dimension_numbers = #tpu.dot_dimension_numbers<[1], [0], [0], [1], [0, 0, 1, 1], [], []>} : vector<16x32xf32>, vector<32x32xf32>, vector<16x32xf32> -> vector<16x32xf32>
    %c0_3 = arith.constant 0 : index
    %c0_4 = arith.constant 0 : index
    %3 = vector.load %arg3[%c0_3, %c0_4] : memref<1x32xf32, #tpu.memory_space<vmem>>, vector<1x32xf32>
    %4 = vector.broadcast %3 : vector<1x32xf32> to vector<16x32xf32>
    %5 = arith.addf %2, %4 : vector<16x32xf32>
    %cst_5 = arith.constant 1.000000e+00 : f32
    %6 = vector.broadcast %cst_5 : f32 to vector<16x32xf32>
    %7 = arith.mulf %6, %5 : vector<16x32xf32>
    %8 = math.sin %7 : vector<16x32xf32>
    %c0_6 = arith.constant 0 : index
    %c0_7 = arith.constant 0 : index
    %9 = vector.load %arg4[%c0_6, %c0_7] : memref<16x32xf32, #tpu.memory_space<vmem>>, vector<16x32xf32>
    tpu.vector_store %arg4[%c0_6, %c0_7], %8 {strides = array<i32>} : memref<16x32xf32, #tpu.memory_space<vmem>>, vector<16x32xf32>,
    return
  }
  func.func @transform_0(%arg0: i32) -> (i32, i32) {
    %c0_i32 = arith.constant 0 : i32
    %c0_i32_0 = arith.constant 0 : i32
    return %arg0, %c0_i32 : i32, i32
  }
  func.func @transform_1(%arg0: i32) -> (i32, i32) {
    %c0_i32 = arith.constant 0 : i32
    %c0_i32_0 = arith.constant 0 : i32
    %c0_i32_1 = arith.constant 0 : i32
    return %c0_i32, %c0_i32_0 : i32, i32
  }
  func.func @transform_2(%arg0: i32) -> (i32, i32) {
    %c0_i32 = arith.constant 0 : i32
    %c0_i32_0 = arith.constant 0 : i32
    %c0_i32_1 = arith.constant 0 : i32
    return %c0_i32, %c0_i32_0 : i32, i32
  }
  func.func @transform_3(%arg0: i32) -> (i32, i32) {
    %c0_i32 = arith.constant 0 : i32
    %c0_i32_0 = arith.constant 0 : i32
    return %arg0, %c0_i32 : i32, i32
  }
}

</mosaic_0001>

<bundles_post_ra>
// kernel: tpu_custom_call.1
= control target key start
LH: loop header
LB: loop body
LE: loop exit
PB: predicated region body
PF: predicated region fallthrough
CT: control target
= control target key end

     0   :  { %8 = vsyncpa [#allocation3], 0  ;;  %s756_s0 = inlined_call_operand.hbm [shape: f32[16,32], index: 0, kind: input, shape index: {}]   ;;  %s757_s1 = inlined_call_operand.hbm [shape: f32[32,32], index: 1, kind: input, shape index: {}]   ;;  %s758_s2 = inlined_call_operand.vmem [shape: f32[1,32], index: 2, kind: input, shape index: {}]   ;;  %s759_s3 = inlined_call_operand.hbm [shape: f32[16,32], index: 3, kind: output, shape index: {}]  }
   0x1   :  { %9 = vsyncpa [#allocation6], 0 }
   0x2   :  { %10 = vsyncpa [#allocation4], 0  ;;  %s15_s14 = sshll.u32 %s756_s0, 4  ;;  %s522_s15 = smov [#allocation2]   ;;  %s16_s14 = int_to_ptr.hbm [resolvable:$true] %s15_s14 }
   0x3   :  { %s17_s16 = sshll.u32 %s522_s15, 4  ;;  %s28_s19 = sshll.u32 %s757_s1, 4  ;;  %s18_s16 = int_to_ptr.vmem [resolvable:$true] %s17_s16  ;;  %s29_s19 = int_to_ptr.hbm [resolvable:$true] %s28_s19 }
   0x4   :  { %s523_s20 = smov 128   ;;  %s524_s21 = smov 8  }
   0x5   :  { %23 = dma.hbm_to_vmem [thread:$0]  %s16_s14, 256, %s18_s16, [#allocation3], %s523_s20, %s523_s20, %s524_s21  }
   0x6   :  { %s525_s22 = smov [#allocation5]  }
   0x7   :  { %s30_s23 = sshll.u32 %s525_s22, 4  ;;  %s31_s23 = int_to_ptr.vmem [resolvable:$true] %s30_s23 }
   0x8   :  { %36 = dma.hbm_to_vmem [thread:$0]  %s29_s19, 512, %s31_s23, [#allocation6], %s523_s20, %s523_s20, %s524_s21  }
   0x9   :  { %516 = dma.done.wait [#allocation3], 256  }
   0xa   :  { %517 = vsyncadd [#allocation3], 4294967040 }
   0xb   :  { %518 = dma.done.wait [#allocation6], 512  }
   0xc   :  { %519 = vsyncadd [#allocation6], 4294966784  ;;  %v52_v0 = vld [vmem:[#allocation5 + $0x18] sm:$0xff]  ;;  %v51_v1 = vld [vmem:[#allocation5 + $0x10] sm:$0xff]  ;;  %vm57_vm0 = vcmask 261120   ;;  %s405_s27 = sshll.u32 %s759_s3, 4  ;;  %s406_s27 = int_to_ptr.hbm [resolvable:$true] %s405_s27 }
   0xd   :  { %76 = vmatpush.msra.mxu0 %v52_v0  ;;  %427 = vmatpush.msra.mxu1 %v52_v0  ;;  %v50_v2 = vld [vmem:[#allocation5 + $0x8] sm:$0xff]  ;;  %v49_v3 = vld [vmem:[#allocation5] sm:$0xff]  ;;  %v47_v4 = vld [vmem:[#allocation2] sm:$0xff]  ;;  %v526_v34 = vmov 683565275  }
   0xe   :  { %v48_v5 = vld [vmem:[#allocation2 + $0x8] sm:$0xff]  ;;  %v443_v6 = vld [vmem:[%s758_s2] ss:$0 sm:$0xff]  ;;  %v527_v36 = vmov 2475754826   ;;  %s533_s2 = smov [#allocation7]  }
   0xf   :  { %77 = vmatpush.msra.mxu0 %v51_v1  ;;  %428 = vmatpush.msra.mxu1 %v51_v1  ;;  %v528_v40 = vmov 2131351028   ;;  %v529_v43 = vmov 2102212464   ;;  %v530_v46 = vmov 920167782  }
  0x10   :  { %v531_v49 = vmov 1326507024   ;;  %s403_s24 = sshll.u32 %s533_s2, 4  ;;  %s404_s24 = int_to_ptr.vmem [resolvable:$true] %s403_s24 }
  0x11   :  { %78 = vmatpush.msra.mxu0 %v50_v2  ;;  %429 = vmatpush.msra.mxu1 %v50_v2 }
  0x13   :  { %79 = vmatpush.msra.mxu0 %v49_v3  ;;  %430 = vmatpush.msra.mxu1 %v49_v3 }
  0x14   :  { %419 = vmatmul.msk.f32.vlgmr.msra.gmra.mxu0 %vm57_vm0, %v47_v4  ;;  %420 = vmatmul.msk.f32.vlgmr.msra.gmra.mxu1 %vm57_vm0, %v48_v5 }
  0x91   :  { %v81_v7 = vpop.f32.mrf.mxu0  ;;  %v84_v8 = vpop.f32.mrf.mxu1 }
  0x92   :  { %v571_v9 = vadd.f32 %v443_v6, %v81_v7  ;;  %v573_v10 = vadd.f32 %v443_v6, %v84_v8 }
  0x94   :  { %v87_v11 = vand.u32 2147483647, %v571_v9  ;;  %v90_v12 = vand.u32 2139095040, %v571_v9  ;;  %v242_v13 = vand.u32 2147483647, %v573_v10  ;;  %v245_v14 = vand.u32 2139095040, %v573_v10 }
  0x96   :  { %v91_v15 = vshrl.u32 %v90_v12, 23  ;;  %v94_v16 = vand.u32 8388607, %v87_v11  ;;  %v246_v17 = vshrl.u32 %v245_v14, 23  ;;  %v249_v20 = vand.u32 8388607, %v242_v13 }
  0x98   :  { %v421_v18 = vadd.s32 4294967169, %v91_v15  ;;  %v95_v19 = vor.u32 8388608, %v94_v16  ;;  %v424_v21 = vadd.s32 4294967169, %v246_v17  ;;  %v250_v25 = vor.u32 8388608, %v249_v20 }
  0x9a   :  { %v97_v22 = vadd.s32 1, %v421_v18  ;;  %v252_v23 = vadd.s32 1, %v424_v21  ;;  %v583_v24 = vshll.u32 %v95_v19, 8  ;;  %v590_v32 = vshll.u32 %v250_v25, 8 }
  0x9c   :  { %vm98_vm1 = vcmp.gt.s32.totalorder %v97_v22, 0  ;;  %vm253_vm2 = vcmp.gt.s32.totalorder %v252_v23, 0  ;;  %v586_v30 = vand.u32 65535, %v583_v24  ;;  %v137_v38 = vshrl.u32 %v583_v24, 16 }
  0x9d   :  { %v99_v26 = vsel %vm98_vm1, %v97_v22, 0  ;;  %v254_v28 = vsel %vm253_vm2, %v252_v23, 0 }
  0x9e   :  { %v101_v27 = vand.u32 31, %v99_v26  ;;  %v588_v31 = vand.u32 31, %v254_v28  ;;  %v592_v33 = vshrl.u32 %v99_v26, 5  ;;  %v630_v17 = vshrl.u32 %v254_v28, 5 }
  0xa0   :  { %v102_v29 = vsub.s32 32, %v101_v27  ;;  %v104_v35 = vshll.u32 %v526_v34, %v101_v27  ;;  %v107_v37 = vshll.u32 %v527_v36, %v101_v27  ;;  %v110_v42 = vshll.u32 %v528_v40, %v101_v27 }
  0xa1   :  { %v113_v45 = vshll.u32 %v529_v43, %v101_v27  ;;  %v116_v48 = vshll.u32 %v530_v46, %v101_v27  ;;  %v602_v54 = vsub.s32 32, %v588_v31  ;;  %vm119_vm3 = vcmp.lt.s32.totalorder %v592_v33, 1 }
  0xa2   :  { %v105_v39 = vshrl.u32 %v527_v36, %v102_v29  ;;  %v108_v41 = vshrl.u32 %v528_v40, %v102_v29  ;;  %v111_v44 = vshrl.u32 %v529_v43, %v102_v29  ;;  %v114_v47 = vshrl.u32 %v530_v46, %v102_v29 }
  0xa3   :  { %v117_v50 = vshrl.u32 %v531_v49, %v102_v29  ;;  %vm120_vm4 = vcmp.lt.s32.totalorder %v592_v33, 2  ;;  %v103_v57 = vshrl.u32 %v526_v34, %v102_v29  ;;  %vm122_vm5 = vcmp.lt.s32.totalorder %v592_v33, 4 }
  0xa4   :  { %v106_v51 = vor.u32 %v105_v39, %v104_v35  ;;  %v109_v52 = vor.u32 %v108_v41, %v107_v37  ;;  %v112_v53 = vor.u32 %v111_v44, %v110_v42  ;;  %v115_v55 = vor.u32 %v114_v47, %v113_v45 }
  0xa5   :  { %v118_v56 = vor.u32 %v117_v50, %v116_v48  ;;  %vm121_vm6 = vcmp.lt.s32.totalorder %v592_v33, 3  ;;  %v259_v62 = vshll.u32 %v526_v34, %v588_v31  ;;  %v260_v2 = vshrl.u32 %v527_v36, %v602_v54 }
  0xa6   :  { %v127_v58 = vsel %vm119_vm3, %v106_v51, %v109_v52  ;;  %v131_v59 = vsel %vm119_vm3, %v109_v52, %v112_v53  ;;  %v128_v60 = vsel %vm122_vm5, %v115_v55, 920167782  ;;  %v124_v63 = vsel %vm122_vm5, %v112_v53, 2102212464 }
  0xa7   :  { %v132_v61 = vsel %vm122_vm5, %v118_v56, 1326507024  ;;  %v129_v0 = vsel %vm121_vm6, %v112_v53, %v128_v60  ;;  %v262_v5 = vshll.u32 %v527_v36, %v588_v31  ;;  %v263_v6 = vshrl.u32 %v528_v40, %v602_v54 }
  0xa8   :  { %v133_v1 = vsel %vm121_vm6, %v115_v55, %v132_v61  ;;  %v130_v3 = vsel %vm120_vm4, %v127_v58, %v129_v0  ;;  %v123_v15 = vsel %vm119_vm3, %v103_v57, %v106_v51  ;;  %v125_v16 = vsel %vm121_vm6, %v109_v52, %v124_v63 }
  0xa9   :  { %v134_v4 = vsel %vm120_vm4, %v131_v59, %v133_v1  ;;  %v160_v12 = vand.u32 65535, %v130_v3  ;;  %v161_v14 = vshrl.u32 %v130_v3, 16  ;;  %v632_v18 = vor.u32 %v260_v2, %v259_v62 }
  0xaa   :  { %v138_v7 = vand.u32 65535, %v134_v4  ;;  %v139_v8 = vshrl.u32 %v134_v4, 16  ;;  %v635_v21 = vor.u32 %v263_v6, %v262_v5  ;;  %v266_v22 = vshrl.u32 %v529_v43, %v602_v54 }
  0xab   :  { %v163_v25 = vmul.u32 %v161_v14, %v586_v30  ;;  %v164_v26 = vmul.u32 %v160_v12, %v137_v38  ;;  %v265_v27 = vshll.u32 %v528_v40, %v588_v31  ;;  %v162_v35 = vmul.u32 %v160_v12, %v586_v30 }
  0xac   :  { %v141_v19 = vmul.u32 %v139_v8, %v586_v30  ;;  %v142_v20 = vmul.u32 %v138_v7, %v137_v38  ;;  %v140_v23 = vmul.u32 %v138_v7, %v586_v30  ;;  %v143_v29 = vmul.u32 %v139_v8, %v137_v38 }
  0xad   :  { %v165_v36 = vmul.u32 %v161_v14, %v137_v38  ;;  %v166_v42 = vshll.u32 %v163_v25, 16  ;;  %v168_v45 = vshll.u32 %v164_v26, 16  ;;  %v267_v47 = vor.u32 %v266_v22, %v265_v27 }
  0xae   :  { %v144_v28 = vshll.u32 %v141_v19, 16  ;;  %v145_v37 = vshrl.u32 %v141_v19, 16  ;;  %v146_v39 = vshll.u32 %v142_v20, 16  ;;  %v147_v41 = vshrl.u32 %v142_v20, 16 }
  0xaf   :  { %v532_v48 = vmov 0   ;;  %vm170_vm8 = vc.u32 %v162_v35, %v166_v42  ;;  %v172_v51 = vadd.s32 %v166_v42, %v162_v35  ;;  %v269_v40 = vshrl.u32 %v530_v46, %v602_v54 }
  0xb0   :  { %vm148_vm7 = vc.u32 %v140_v23, %v144_v28  ;;  %v150_v44 = vadd.s32 %v144_v28, %v140_v23  ;;  %v171_v30 = vsel %vm170_vm8, 1, %v532_v48  ;;  %v268_v38 = vshll.u32 %v529_v43, %v588_v31 }
  0xb1   :  { %v149_v50 = vsel %vm148_vm7, 1, %v532_v48  ;;  %v173_v55 = vadd.s32 %v171_v30, %v165_v36  ;;  %vm174_vm10 = vc.u32 %v172_v51, %v168_v45  ;;  %v271_v56 = vshll.u32 %v530_v46, %v588_v31 }
  0xb2   :  { %v151_v52 = vadd.s32 %v149_v50, %v143_v29  ;;  %vm152_vm9 = vc.u32 %v150_v44, %v146_v39  ;;  %v175_v58 = vsel %vm174_vm10, 1, %v532_v48  ;;  %v270_v59 = vor.u32 %v269_v40, %v268_v38 }
  0xb3   :  { %v153_v53 = vsel %vm152_vm9, 1, %v532_v48  ;;  %v272_v60 = vshrl.u32 %v531_v49, %v602_v54  ;;  %v167_v61 = vshrl.u32 %v163_v25, 16  ;;  %v169_v62 = vshrl.u32 %v164_v26, 16 }
  0xb4   :  { %v155_v57 = vadd.s32 %v153_v53, %v151_v52  ;;  %v655_v63 = vadd.s32 %v172_v51, %v168_v45  ;;  %v177_v0 = vadd.s32 %v175_v58, %v173_v55  ;;  %vm274_vm11 = vcmp.lt.s32.totalorder %v630_v17, 1 }
  0xb5   :  { %v273_v1 = vor.u32 %v272_v60, %v271_v56  ;;  %vm277_vm12 = vcmp.lt.s32.totalorder %v630_v17, 4  ;;  %vm276_vm13 = vcmp.lt.s32.totalorder %v630_v17, 3  ;;  %v282_v31 = vsel %vm274_vm11, %v632_v18, %v635_v21 }
  0xb6   :  { %v156_v43 = vadd.s32 %v155_v57, %v145_v37  ;;  %v178_v2 = vadd.s32 %v177_v0, %v167_v61  ;;  %v283_v46 = vsel %vm277_vm12, %v270_v59, 920167782  ;;  %vm275_vm14 = vcmp.lt.s32.totalorder %v630_v17, 2 }
  0xb7   :  { %v284_v3 = vsel %vm276_vm13, %v267_v47, %v283_v46  ;;  %v286_v4 = vsel %vm274_vm11, %v635_v21, %v267_v47  ;;  %v126_v5 = vsel %vm120_vm4, %v123_v15, %v125_v16  ;;  %v287_v8 = vsel %vm277_vm12, %v273_v1, 1326507024 }
  0xb8   :  { %v666_v49 = vadd.s32 %v156_v43, %v147_v41  ;;  %v179_v6 = vadd.s32 %v178_v2, %v169_v62  ;;  %v285_v7 = vsel %vm275_vm14, %v282_v31, %v284_v3  ;;  %v288_v12 = vsel %vm276_vm13, %v270_v59, %v287_v8 }
  0xb9   :  { %v291_v14 = vand.u32 65535, %v590_v32  ;;  %v315_v19 = vand.u32 65535, %v285_v7  ;;  %v289_v33 = vsel %vm275_vm14, %v286_v4, %v288_v12  ;;  %v292_v15 = vshrl.u32 %v590_v32, 16 }
  0xba   :  { %vm182_vm15 = vc.u32 %v666_v49, %v655_v63  ;;  %v183_v20 = vadd.s32 1, %v179_v6  ;;  %v316_v16 = vshrl.u32 %v285_v7, 16  ;;  %v180_v22 = vmul.u32 %v583_v24, %v126_v5 }
  0xbb   :  { %v293_v23 = vand.u32 65535, %v289_v33  ;;  %v294_v25 = vshrl.u32 %v289_v33, 16  ;;  %v319_v29 = vmul.u32 %v315_v19, %v292_v15  ;;  %v258_v35 = vshrl.u32 %v526_v34, %v602_v54 }
  0xbc   :  { %v184_v26 = vsel %vm182_vm15, %v183_v20, %v179_v6  ;;  %v318_v27 = vmul.u32 %v316_v16, %v291_v14  ;;  %v279_v39 = vsel %vm277_vm12, %v267_v47, 2102212464  ;;  %v317_v41 = vmul.u32 %v315_v19, %v291_v14 }
  0xbd   :  { %v185_v28 = vadd.s32 %v184_v26, %v180_v22  ;;  %v296_v36 = vmul.u32 %v294_v25, %v291_v14  ;;  %v297_v37 = vmul.u32 %v293_v23, %v292_v15  ;;  %v320_v42 = vmul.u32 %v316_v16, %v292_v15 }
  0xbe   :  { %v321_v44 = vshll.u32 %v318_v27, 16  ;;  %v295_v50 = vmul.u32 %v293_v23, %v291_v14  ;;  %v298_v24 = vmul.u32 %v294_v25, %v292_v15  ;;  %v323_v52 = vshll.u32 %v319_v29, 16 }
  0xbf   :  { %v186_v45 = vadd.s32 536870912, %v185_v28  ;;  %v299_v51 = vshll.u32 %v296_v36, 16  ;;  %v301_v40 = vshll.u32 %v297_v37, 16  ;;  %v278_v56 = vsel %vm274_vm11, %v258_v35, %v632_v18 }
  0xc0   :  { %vm325_vm1 = vc.u32 %v317_v41, %v321_v44  ;;  %v327_v30 = vadd.s32 %v321_v44, %v317_v41  ;;  %v280_v58 = vsel %vm276_vm13, %v635_v21, %v279_v39  ;;  %v322_v60 = vshrl.u32 %v318_v27, 16 }
  0xc1   :  { %v693_v38 = vshrl.u32 %v186_v45, 30  ;;  %vm303_vm2 = vc.u32 %v295_v50, %v299_v51  ;;  %v305_v34 = vadd.s32 %v299_v51, %v295_v50  ;;  %v326_v54 = vsel %vm325_vm1, 1, %v532_v48 }
  0xc2   :  { %v304_v53 = vsel %vm303_vm2, 1, %v532_v48  ;;  %v328_v47 = vadd.s32 %v326_v54, %v320_v42  ;;  %vm329_vm3 = vc.u32 %v327_v30, %v323_v52  ;;  %v300_v0 = vshrl.u32 %v296_v36, 16 }
  0xc3   :  { %v188_v55 = vshll.u32 %v693_v38, 30  ;;  %v306_v57 = vadd.s32 %v304_v53, %v298_v24  ;;  %vm307_vm4 = vc.u32 %v305_v34, %v301_v40  ;;  %v330_v61 = vsel %vm329_vm3, 1, %v532_v48 }
  0xc4   :  { %v308_v59 = vsel %vm307_vm4, 1, %v532_v48  ;;  %v332_v1 = vadd.s32 %v330_v61, %v328_v47  ;;  %v302_v2 = vshrl.u32 %v297_v37, 16  ;;  %v324_v31 = vshrl.u32 %v319_v29, 16 }
  0xc5   :  { %v189_v62 = vsub.s32 %v185_v28, %v188_v55  ;;  %v310_v43 = vadd.s32 %v308_v59, %v306_v57  ;;  %v281_v4 = vsel %vm275_vm14, %v278_v56, %v280_v58  ;;  %v331_v6 = vadd.s32 %v327_v30, %v323_v52 }
  0xc6   :  { %v333_v3 = vadd.s32 %v332_v1, %v322_v60  ;;  %v335_v14 = vmul.u32 %v590_v32, %v281_v4  ;;  %v181_v15 = vadd.s32 %v655_v63, %v666_v49  ;;  %vm89_vm9 = vcmp.lt.s32.totalorder %v571_v9, 0 }
  0xc7   :  { %vm190_vm5 = vcmp.lt.s32.totalorder %v189_v62, 0  ;;  %v191_v46 = vsub.s32 0, %v189_v62  ;;  %v311_v18 = vadd.s32 %v310_v43, %v300_v0  ;;  %vm717_vm10 = vcmp.le.f32.partialorder %v87_v11, 0.7853982 }
  0xc8   :  { %v334_v7 = vadd.s32 %v333_v3, %v324_v31  ;;  %v211_v51 = vsub.s32 4, %v693_v38  ;;  %vm244_vm12 = vcmp.lt.s32.totalorder %v573_v10, 0  ;;  %vm731_vm13 = vcmp.le.f32.partialorder %v242_v13, 0.7853982 }
  0xc9   :  { %v192_v5 = vsel %vm190_vm5, %v191_v46, %v189_v62  ;;  %v312_v21 = vadd.s32 %v311_v18, %v302_v2  ;;  %vm230_vm2 = vweird.f32 %v571_v9 }
  0xca   :  { %v193_v8 = vclz %v192_v5  ;;  %v338_v48 = vadd.s32 1, %v334_v7  ;;  %v212_v11 = vsel %vm89_vm9, %v211_v51, %v693_v38 }
  0xcb   :  { %vm337_vm6 = vc.u32 %v312_v21, %v331_v6  ;;  %v336_v34 = vadd.s32 %v331_v6, %v312_v21  ;;  %v214_v0 = vsel %vm717_vm10, 0, %v212_v11 }
  0xcc   :  { %v422_v12 = vadd.s32 4294967294, %v193_v8  ;;  %v339_v19 = vsel %vm337_vm6, %v338_v48, %v334_v7  ;;  %v231_v4 = vadd.s32 3, %v214_v0  ;;  %vm385_vm6 = vweird.f32 %v573_v10 }
  0xcd   :  { %v340_v20 = vadd.s32 %v339_v19, %v335_v14 }
  0xce   :  { %vm423_vm7 = vcmp.lt.s32.totalorder %v422_v12, 0  ;;  %v232_v48 = vand.u32 3, %v231_v4 }
  0xcf   :  { %v196_v33 = vsel %vm423_vm7, 0, %v422_v12  ;;  %v341_v22 = vadd.s32 536870912, %v340_v20 }
  0xd0   :  { %v197_v16 = vsub.s32 32, %v196_v33  ;;  %v201_v17 = vsub.s32 4294967266, %v196_v33  ;;  %v198_v23 = vshll.u32 %v189_v62, %v196_v33  ;;  %vm234_vm14 = vcmp.eq.s32.totalorder %v232_v48, 0 }
  0xd1   :  { %v711_v27 = vshrl.u32 %v341_v22, 30  ;;  %vm237_vm15 = vcmp.eq.s32.totalorder %v232_v48, 2  ;;  %vm233_vm1 = vcmp.lt.s32.totalorder %v232_v48, 2 }
  0xd2   :  { %v199_v25 = vshrl.u32 %v181_v15, %v197_v16  ;;  %v202_v26 = vadd.s32 127, %v201_v17 }
  0xd3   :  { %v343_v35 = vshll.u32 %v711_v27, 30  ;;  %v366_v33 = vsub.s32 4, %v711_v27 }
  0xd4   :  { %v200_v29 = vor.u32 %v199_v25, %v198_v23  ;;  %v203_v28 = vshll.u32 %v202_v26, 23 }
  0xd5   :  { %v344_v36 = vsub.s32 %v340_v20, %v343_v35 }
  0xd6   :  { %v204_v32 = vor.u32 4788187, %v203_v28  ;;  %v207_v39 = vcvt.s32.f32 %v200_v29  ;;  %v367_v29 = vsel %vm244_vm12, %v366_v33, %v711_v27 }
  0xd7   :  { %vm345_vm8 = vcmp.lt.s32.totalorder %v344_v36, 0  ;;  %v346_v41 = vsub.s32 0, %v344_v36 }
  0xd8   :  { %v205_v37 = vand.u32 2147483647, %v204_v32 }
  0xd9   :  { %v347_v63 = vsel %vm345_vm8, %v346_v41, %v344_v36 }
  0xda   :  { %v208_v42 = vmul.f32 %v207_v39, %v205_v37  ;;  %v348_v49 = vclz %v347_v63 }
  0xdc   :  { %v209_v44 = vxor.u32 2147483648, %v208_v42  ;;  %v425_v45 = vadd.s32 4294967294, %v348_v49 }
  0xde   :  { %v210_v24 = vsel %vm89_vm9, %v209_v44, %v208_v42  ;;  %vm426_vm11 = vcmp.lt.s32.totalorder %v425_v45, 0 }
  0xdf   :  { %v213_v40 = vsel %vm717_vm10, %v571_v9, %v210_v24  ;;  %v351_v30 = vsel %vm426_vm11, 0, %v425_v45 }
  0xe0   :  { %v215_v52 = vmul.f32 %v213_v40, %v213_v40  ;;  %v352_v54 = vsub.s32 32, %v351_v30  ;;  %v356_v53 = vsub.s32 4294967266, %v351_v30  ;;  %v353_v56 = vshll.u32 %v344_v36, %v351_v30 }
  0xe1   :  { %v369_v36 = vsel %vm731_vm13, 0, %v367_v29 }
  0xe2   :  { %v223_v47 = vmul.f32 -0.00019511016, %v215_v52  ;;  %v216_v55 = vmul.f32 -0.001358992, %v215_v52  ;;  %v354_v57 = vshrl.u32 %v336_v34, %v352_v54  ;;  %v357_v58 = vadd.s32 127, %v356_v53 }
  0xe3   :  { %v386_v63 = vadd.s32 3, %v369_v36 }
  0xe4   :  { %v224_v59 = vadd.f32 0.008332121, %v223_v47  ;;  %v217_v60 = vadd.f32 0.041655596, %v216_v55  ;;  %v355_v61 = vor.u32 %v354_v57, %v353_v56  ;;  %v358_v62 = vshll.u32 %v357_v58, 23 }
  0xe5   :  { %v387_v50 = vand.u32 3, %v386_v63 }
  0xe6   :  { %v225_v43 = vmul.f32 %v224_v59, %v215_v52  ;;  %v218_v1 = vmul.f32 %v217_v60, %v215_v52  ;;  %v359_v2 = vor.u32 4788187, %v358_v62  ;;  %v362_v3 = vcvt.s32.f32 %v355_v61 }
  0xe7   :  { %vm389_vm3 = vcmp.eq.s32.totalorder %v387_v50, 0  ;;  %vm392_vm4 = vcmp.eq.s32.totalorder %v387_v50, 2  ;;  %vm388_vm5 = vcmp.lt.s32.totalorder %v387_v50, 2 }
  0xe8   :  { %v226_v31 = vadd.f32 -0.16666654, %v225_v43  ;;  %v219_v46 = vadd.f32 -0.4999988, %v218_v1  ;;  %v360_v18 = vand.u32 2147483647, %v359_v2 }
  0xea   :  { %v227_v5 = vmul.f32 %v226_v31, %v215_v52  ;;  %v220_v38 = vmul.f32 %v219_v46, %v215_v52  ;;  %v363_v21 = vmul.f32 %v362_v3, %v360_v18 }
  0xec   :  { %v228_v6 = vadd.f32 1.0, %v227_v5  ;;  %v221_v7 = vadd.f32 1.0, %v220_v38  ;;  %v364_v8 = vxor.u32 2147483648, %v363_v21 }
  0xee   :  { %v229_v12 = vmul.f32 %v228_v6, %v213_v40  ;;  %v238_v14 = vxor.u32 2147483648, %v221_v7  ;;  %v365_v20 = vsel %vm244_vm12, %v364_v8, %v363_v21 }
  0xef   :  { %v368_v15 = vsel %vm731_vm13, %v573_v10, %v365_v20 }
  0xf0   :  { %v235_v16 = vxor.u32 2147483648, %v229_v12  ;;  %v370_v17 = vmul.f32 %v368_v15, %v368_v15  ;;  %v239_v23 = vsel %vm237_vm15, %v238_v14, %v229_v12 }
  0xf2   :  { %v236_v22 = vsel %vm234_vm14, %v221_v7, %v235_v16  ;;  %v378_v13 = vmul.f32 -0.00019511016, %v370_v17  ;;  %v371_v26 = vmul.f32 -0.001358992, %v370_v17 }
  0xf3   :  { %v240_v25 = vsel %vm233_vm1, %v236_v22, %v239_v23 }
  0xf4   :  { %v241_v28 = vsel %vm230_vm2, nan, %v240_v25  ;;  %v379_v35 = vadd.f32 0.008332121, %v378_v13  ;;  %v372_v32 = vadd.f32 0.041655596, %v371_v26 }
  0xf5   :  { %397 = vst.msk [vmem:[#allocation7] sm:$0xff] %vm57_vm0, %v241_v28 }
  0xf6   :  { %v380_v37 = vmul.f32 %v379_v35, %v370_v17  ;;  %v373_v39 = vmul.f32 %v372_v32, %v370_v17 }
  0xf8   :  { %v381_v41 = vadd.f32 -0.16666654, %v380_v37  ;;  %v374_v42 = vadd.f32 -0.4999988, %v373_v39 }
  0xfa   :  { %v382_v9 = vmul.f32 %v381_v41, %v370_v17  ;;  %v375_v49 = vmul.f32 %v374_v42, %v370_v17 }
  0xfc   :  { %v383_v44 = vadd.f32 1.0, %v382_v9  ;;  %v376_v45 = vadd.f32 1.0, %v375_v49 }
  0xfe   :  { %v384_v24 = vmul.f32 %v383_v44, %v368_v15  ;;  %v393_v27 = vxor.u32 2147483648, %v376_v45 }
 0x100   :  { %v390_v51 = vxor.u32 2147483648, %v384_v24  ;;  %v394_v52 = vsel %vm392_vm4, %v393_v27, %v384_v24 }
 0x102   :  { %v391_v40 = vsel %vm389_vm3, %v376_v45, %v390_v51 }
 0x103   :  { %v395_v30 = vsel %vm388_vm5, %v391_v40, %v394_v52 }
 0x104   :  { %v396_v34 = vsel %vm385_vm6, nan, %v395_v30 }
 0x105   :  { %398 = vst.msk [vmem:[#allocation7 + $0x8] sm:$0xff] %vm57_vm0, %v396_v34 }
 0x106   :  { %411 = dma.vmem_to_hbm [thread:$0]  %s404_s24, 256, %s406_s27, [#allocation4], %s523_s20, %s523_s20, %s524_s21  }
 0x107   :  { %520 = dma.done.wait [#allocation4], 256  }
 0x108   :  { %521 = vsyncadd [#allocation4], 4294967040 }
 0x109   :  { %416 = vsyncpa [#allocation3], 1 }
 0x10a   :  { %417 = vsyncpa [#allocation6], 1 }
 0x10b   :  { %418 = vsyncpa [#allocation4], 1 }

</bundles_post_ra>
